<compile_context>
chip_gen: v7x
topology: tpu7x:2x2x1
jax: 0.10.0
libtpu: 0.0.40
codegen_flags: <defaults>
</compile_context>

<pallas_src>
import functools
import math

import jax
import jax.numpy as jnp
from jax.experimental import pallas as pl
from jax.experimental.pallas import tpu as pltpu


# ----------------------------- tiling heuristic -------------------------------

_LANE = 128
_VMEM_BUDGET = 24 * 1024 * 1024    # per-step working set target (lane-padded accounting)
_MAX_TILE_ROWS = 8192              # row-tile cap (per review: 1-4 MiB real output / step)
_VMEM_LIMIT = 48 * 1024 * 1024     # explicit scoped-VMEM limit (safe on v5e/v6e/v7x)


def _round_up(x, m):
    return ((x + m - 1) // m) * m


def _choose_tiling(M, cin, cmax, cout, in_itemsize, out_itemsize):
    """Pick (tile_m, grid): big row tiles bounded by a VMEM budget, even grid >= 2."""
    # Lane-padded bytes/row live at once: 2x input buf, 2x output buf, ~2 f32 intermediates.
    row_bytes = (2 * _round_up(cin, _LANE) * in_itemsize
                 + 2 * _round_up(cout, _LANE) * out_itemsize
                 + 2 * _round_up(cmax, _LANE) * 4)
    cap = (_VMEM_BUDGET // row_bytes) // _LANE * _LANE
    cap = max(256, min(_MAX_TILE_ROWS, cap))
    if M <= 256:
        return M, 1                              # tiny problem: one full block (always legal)
    n_steps = max(2, 2 * pl.cdiv(M, 2 * cap))    # even step count -> both v7x TCs stay busy
    tile_m = min(cap, _round_up(pl.cdiv(M, n_steps), _LANE))
    return tile_m, pl.cdiv(M, tile_m)


# ----------------------------- fused Pallas kernel ----------------------------

def fused_conv_bn_relu_stack(x2d, w_packed, s_packed, layer_dims, *, out_dtype=None):
    """Fused per-scale stack of (Conv1x1 + folded-BN + ReLU) layers, channels-last.

    x2d:        (M, Cin0) activations (any float dtype; accumulation is f32).
    w_packed:   (L, Cmax, Cmax) f32, layer l's folded weight W_l^T placed at
                [l, :Cin_l, :Cout_l], zeros elsewhere.
    s_packed:   (L, 1, Cmax) f32 folded shifts, zeros in padded lanes.
    layer_dims: ((Cin_0, Cout_0), ..., (Cin_{L-1}, Cout_{L-1})).
    Returns:    (M, Cout_last) in out_dtype (defaults to x2d.dtype).
    """
    M, cin0 = x2d.shape
    L, cmax, _ = w_packed.shape
    cout_last = layer_dims[-1][1]
    out_dtype = x2d.dtype if out_dtype is None else jnp.dtype(out_dtype)

    tile_m, grid_m = _choose_tiling(M, cin0, cmax, cout_last,
                                    jnp.dtype(x2d.dtype).itemsize,
                                    jnp.dtype(out_dtype).itemsize)

    def kernel(x_ref, w_ref, s_ref, o_ref):
        # Layer 0: contract over the true Cin0 rows of the padded weight slab.
        h = jnp.dot(x_ref[...], w_ref[0][:cin0, :],
                    preferred_element_type=jnp.float32)
        h = jnp.maximum(h + s_ref[0], 0.0)
        # Remaining layers: padded lanes of h are exactly zero, so contracting over the
        # full Cmax is numerically identical to the un-padded contraction.
        for l in range(1, L):
            y = jnp.dot(h, w_ref[l], preferred_element_type=jnp.float32)
            h = jnp.maximum(y + s_ref[l], 0.0)
        o_ref[...] = h[:, :cout_last].astype(o_ref.dtype)

    # Advisory cost estimate (helps XLA schedule surrounding ops).
    flops = 2 * M * sum(ci * co for ci, co in layer_dims)
    bytes_accessed = (M * cin0 * jnp.dtype(x2d.dtype).itemsize
                      + M * cout_last * jnp.dtype(out_dtype).itemsize
                      + int(w_packed.size) * 4 + int(s_packed.size) * 4)
    cost = pl.CostEstimate(flops=int(flops), transcendentals=0,
                           bytes_accessed=int(bytes_accessed))

    return pl.pallas_call(
        kernel,
        out_shape=jax.ShapeDtypeStruct((M, cout_last), out_dtype),
        grid=(grid_m,),
        in_specs=[
            pl.BlockSpec((tile_m, cin0), lambda i: (i, 0)),        # row tile of x
            pl.BlockSpec((L, cmax, cmax), lambda i: (0, 0, 0)),    # resident weight slab
            pl.BlockSpec((L, 1, cmax), lambda i: (0, 0, 0)),       # resident shift slab
        ],
        out_specs=pl.BlockSpec((tile_m, cout_last), lambda i: (i, 0)),
        compiler_params=pltpu.CompilerParams(
            dimension_semantics=("parallel",),
            vmem_limit_bytes=_VMEM_LIMIT),
        cost_estimate=cost,
    )(x2d, w_packed, s_packed)


# --------------------------- Parameter construction ---------------------------

def init_transition_block_params(key, nb_scales, input_channels, list_dim_slp):
    """Deterministic synthetic parameters matching the PyTorch module layout.

    Conv bias + eval-mode BatchNorm are folded:
      y = ((x @ W^T + b) - mean) * gamma/sqrt(var+eps) + beta
        = x @ (W * s)^T + ((b - mean) * s + beta),   s = gamma/sqrt(var+eps)

    Returns {"layers": flat per-layer list (PyTorch cpt order, for the reference),
             "scales": per-scale packed operands for the fused kernel}.
    """
    eps = 1e-5
    flat = []
    for i in range(nb_scales):
        last_channel = input_channels[i]
        for out_channel in list_dim_slp[i]:
            key, k_w, k_b, k_g, k_be, k_m, k_v = jax.random.split(key, 7)
            bound = 1.0 / math.sqrt(last_channel)
            w = jax.random.uniform(k_w, (out_channel, last_channel),
                                   jnp.float32, -bound, bound)
            b = jax.random.uniform(k_b, (out_channel,), jnp.float32, -bound, bound)
            gamma = 1.0 + 0.1 * jax.random.normal(k_g, (out_channel,), jnp.float32)
            beta = 0.1 * jax.random.normal(k_be, (out_channel,), jnp.float32)
            run_mean = 0.1 * jax.random.normal(k_m, (out_channel,), jnp.float32)
            run_var = jnp.abs(1.0 + 0.1 * jax.random.normal(k_v, (out_channel,),
                                                            jnp.float32))
            s = gamma / jnp.sqrt(run_var + eps)
            flat.append({"w_folded": w * s[:, None],                    # (Cout, Cin)
                         "shift": ((b - run_mean) * s + beta)[:, None]})  # (Cout, 1)
            last_channel = out_channel

    # Pack each scale's layers into single zero-padded weight/shift slabs.
    scales = []
    cpt = 0
    for i in range(nb_scales):
        L = len(list_dim_slp[i])
        layers = flat[cpt:cpt + L]
        cpt += L
        dims = []
        c_in = input_channels[i]
        for c_out in list_dim_slp[i]:
            dims.append((c_in, c_out))
            c_in = c_out
        cmax = max(max(ci, co) for ci, co in dims)
        w_packed = jnp.zeros((L, cmax, cmax), jnp.float32)
        s_packed = jnp.zeros((L, 1, cmax), jnp.float32)
        for l, (p, (ci, co)) in enumerate(zip(layers, dims)):
            w_packed = w_packed.at[l, :ci, :co].set(p["w_folded"].T)
            s_packed = s_packed.at[l, 0, :co].set(p["shift"][:, 0])
        scales.append({"w_packed": w_packed, "s_packed": s_packed,
                       "dims": tuple(dims)})
    return {"layers": flat, "scales": scales}


# ------------------------------- Forward pass ----------------------------------

def transition_block_forward(list_x_complete, params, nb_scales, list_dim_slp,
                             out_dtype=None):
    """list_x_complete[i]: (B, N, Cin_i) -> list of (B, N, Cout_i_last).  No HBM
    transposes: only (free) reshapes collapsing/restoring the (B, N) leading dims."""
    del list_dim_slp  # layer structure comes from the packed params
    outs = []
    for i in range(nb_scales):
        x = list_x_complete[i]
        B, N, C = x.shape
        sc = params["scales"][i]
        assert C == sc["dims"][0][0], (C, sc["dims"])
        y2d = fused_conv_bn_relu_stack(x.reshape(B * N, C), sc["w_packed"],
                                       sc["s_packed"], sc["dims"],
                                       out_dtype=out_dtype)
        outs.append(y2d.reshape(B, N, -1))
    return outs


def _reference_forward(list_x_complete, params, nb_scales, list_dim_slp):
    """Pure-JAX reference (same folded math, per-layer, channels-last)."""
    cpt = 0
    outs = []
    for i in range(nb_scales):
        x = list_x_complete[i]
        B, N, C = x.shape
        h = x.reshape(B * N, C)
        for _ in range(len(list_dim_slp[i])):
            p = params["layers"][cpt]
            h = jnp.maximum(h @ p["w_folded"].T + p["shift"][:, 0], 0.0)
            cpt += 1
        outs.append(h.reshape(B, N, -1))
    return outs


# ---------------------------------- Demo ---------------------------------------

if __name__ == "__main__":
    nb_scales = 2
    input_channels = [4, 8]
    list_dim_slp = [[16, 32], [16]]

    key = jax.random.PRNGKey(0)
    key, kp = jax.random.split(key)
    params = init_transition_block_params(kp, nb_scales, input_channels, list_dim_slp)

    fwd = functools.partial(transition_block_forward, nb_scales=nb_scales,
                            list_dim_slp=list_dim_slp)

    # (B, N) cases: tiny single full block, even 2-step grid, ragged tail block.
    for (B, N) in [(2, 16), (2, 384), (2, 321)]:
        keys = jax.random.split(jax.random.fold_in(key, N), nb_scales)
        list_x = [jax.random.normal(keys[i], (B, N, input_channels[i]), jnp.float32)
                  for i in range(nb_scales)]

        outs = jax.block_until_ready(fwd(list_x, params))
        refs = _reference_forward(list_x, params, nb_scales, list_dim_slp)

        for i, (o, r) in enumerate(zip(outs, refs)):
            assert o.shape == (B, N, list_dim_slp[i][-1]), (o.shape, B, N, i)
            assert bool(jnp.all(o >= 0.0))                      # ReLU output
            assert bool(jnp.allclose(o, r, atol=1e-4, rtol=1e-4)), (B, N, i)

    print("KERNEL_OK")
</pallas_src>

<mosaic_0001>
module attributes {stable_mosaic.version = 11 : i64} {
  func.func @kernel(%arg0: i32, %arg1: memref<32x4xf32, #tpu.memory_space<vmem>>, %arg2: memref<2x32x32xf32, #tpu.memory_space<vmem>>, %arg3: memref<2x1x32xf32, #tpu.memory_space<vmem>>, %arg4: memref<32x32xf32, #tpu.memory_space<vmem>>) attributes {dimension_semantics = [#tpu.dimension_semantics<parallel>], iteration_bounds = array<i64: 1>, scalar_prefetch = 0 : i64, scratch_operands = 0 : i64, tpu.core_type = #tpu.core_type<tc>, window_params = [{transform_indices = @transform_0, window_bounds = array<i64: 32, 4>}, {pipeline_mode = #tpu.pipeline_mode<synchronous>, transform_indices = @transform_1, window_bounds = array<i64: 2, 32, 32>}, {pipeline_mode = #tpu.pipeline_mode<synchronous>, transform_indices = @transform_2, window_bounds = array<i64: 2, 1, 32>}, {transform_indices = @transform_3, window_bounds = array<i64: 32, 32>}]} {
    %c0 = arith.constant 0 : index
    %c0_0 = arith.constant 0 : index
    %0 = vector.load %arg1[%c0, %c0_0] : memref<32x4xf32, #tpu.memory_space<vmem>>, vector<32x4xf32>
    %c0_1 = arith.constant 0 : index
    %c0_2 = arith.constant 0 : index
    %c0_3 = arith.constant 0 : index
    %1 = vector.load %arg2[%c0_1, %c0_2, %c0_3] : memref<2x32x32xf32, #tpu.memory_space<vmem>>, vector<1x32x32xf32>
    %2 = vector.shape_cast %1 : vector<1x32x32xf32> to vector<32x32xf32>
    %3 = vector.extract_strided_slice %2 {offsets = [0, 0], sizes = [4, 32], strides = [1, 1]} : vector<32x32xf32> to vector<4x32xf32>
    %cst = arith.constant dense<0.000000e+00> : vector<32x32xf32>
    %4 = tpu.matmul %0, %3, %cst {dimension_numbers = #tpu.dot_dimension_numbers<[1], [0], [0], [1], [0, 0, 1, 1], [], []>} : vector<32x4xf32>, vector<4x32xf32>, vector<32x32xf32> -> vector<32x32xf32>
    %c0_4 = arith.constant 0 : index
    %c0_5 = arith.constant 0 : index
    %c0_6 = arith.constant 0 : index
    %5 = vector.load %arg3[%c0_4, %c0_5, %c0_6] : memref<2x1x32xf32, #tpu.memory_space<vmem>>, vector<1x1x32xf32>
    %6 = vector.shape_cast %5 : vector<1x1x32xf32> to vector<1x32xf32>
    %7 = vector.broadcast %6 : vector<1x32xf32> to vector<32x32xf32>
    %8 = arith.addf %4, %7 : vector<32x32xf32>
    %cst_7 = arith.constant 0.000000e+00 : f32
    %9 = vector.broadcast %cst_7 : f32 to vector<32x32xf32>
    %10 = arith.maximumf %8, %9 : vector<32x32xf32>
    %c1 = arith.constant 1 : index
    %c0_8 = arith.constant 0 : index
    %c0_9 = arith.constant 0 : index
    %11 = vector.load %arg2[%c1, %c0_8, %c0_9] : memref<2x32x32xf32, #tpu.memory_space<vmem>>, vector<1x32x32xf32>
    %12 = vector.shape_cast %11 : vector<1x32x32xf32> to vector<32x32xf32>
    %cst_10 = arith.constant dense<0.000000e+00> : vector<32x32xf32>
    %13 = tpu.matmul %10, %12, %cst_10 {dimension_numbers = #tpu.dot_dimension_numbers<[1], [0], [0], [1], [0, 0, 1, 1], [], []>} : vector<32x32xf32>, vector<32x32xf32>, vector<32x32xf32> -> vector<32x32xf32>
    %c1_11 = arith.constant 1 : index
    %c0_12 = arith.constant 0 : index
    %c0_13 = arith.constant 0 : index
    %14 = vector.load %arg3[%c1_11, %c0_12, %c0_13] : memref<2x1x32xf32, #tpu.memory_space<vmem>>, vector<1x1x32xf32>
    %15 = vector.shape_cast %14 : vector<1x1x32xf32> to vector<1x32xf32>
    %16 = vector.broadcast %15 : vector<1x32xf32> to vector<32x32xf32>
    %17 = arith.addf %13, %16 : vector<32x32xf32>
    %cst_14 = arith.constant 0.000000e+00 : f32
    %18 = vector.broadcast %cst_14 : f32 to vector<32x32xf32>
    %19 = arith.maximumf %17, %18 : vector<32x32xf32>
    %c0_15 = arith.constant 0 : index
    %c0_16 = arith.constant 0 : index
    %20 = vector.load %arg4[%c0_15, %c0_16] : memref<32x32xf32, #tpu.memory_space<vmem>>, vector<32x32xf32>
    tpu.vector_store %arg4[%c0_15, %c0_16], %19 {strides = array<i32>} : memref<32x32xf32, #tpu.memory_space<vmem>>, vector<32x32xf32>,
    return
  }
  func.func @transform_0(%arg0: i32) -> (i32, i32) {
    %c0_i32 = arith.constant 0 : i32
    %c0_i32_0 = arith.constant 0 : i32
    return %arg0, %c0_i32 : i32, i32
  }
  func.func @transform_1(%arg0: i32) -> (i32, i32, i32) {
    %c0_i32 = arith.constant 0 : i32
    %c0_i32_0 = arith.constant 0 : i32
    %c0_i32_1 = arith.constant 0 : i32
    %c0_i32_2 = arith.constant 0 : i32
    return %c0_i32, %c0_i32_0, %c0_i32_1 : i32, i32, i32
  }
  func.func @transform_2(%arg0: i32) -> (i32, i32, i32) {
    %c0_i32 = arith.constant 0 : i32
    %c0_i32_0 = arith.constant 0 : i32
    %c0_i32_1 = arith.constant 0 : i32
    %c0_i32_2 = arith.constant 0 : i32
    return %c0_i32, %c0_i32_0, %c0_i32_1 : i32, i32, i32
  }
  func.func @transform_3(%arg0: i32) -> (i32, i32) {
    %c0_i32 = arith.constant 0 : i32
    %c0_i32_0 = arith.constant 0 : i32
    return %arg0, %c0_i32 : i32, i32
  }
}

</mosaic_0001>

<bundles_post_ra>
// kernel: tpu_custom_call.1
= control target key start
LH: loop header
LB: loop body
LE: loop exit
PB: predicated region body
PF: predicated region fallthrough
CT: control target
= control target key end

     0   :  { %8 = vsyncpa [#allocation3], 0  ;;  %s478_s0 = inlined_call_operand.vmem [shape: f32[32,4], index: 0, kind: input, shape index: {}]   ;;  %s479_s1 = inlined_call_operand.hbm [shape: f32[2,32,32], index: 1, kind: input, shape index: {}]   ;;  %s480_s2 = inlined_call_operand.vmem [shape: f32[2,1,32], index: 2, kind: input, shape index: {}]   ;;  %s481_s3 = inlined_call_operand.hbm [shape: f32[32,32], index: 3, kind: output, shape index: {}]  }
   0x1   :  { %9 = vsyncpa [#allocation4], 0  ;;  %s394_s12 = smov [#allocation2]   ;;  %s346_s16 = scalar_lea.hbm %s479_s1, 1024 }
   0x2   :  { %s17_s13 = sshll.u32 %s394_s12, 4  ;;  %p347_p0 = scmp.ne.s32.totalorder %s479_s1, %s346_s16  ;;  %s18_s13 = int_to_ptr.vmem [resolvable:$true] %s17_s13 }
   0x3   :  { %p350_p1 = scmp.lt.u32.totalorder %s346_s16, %s479_s1 }
   0x5   :  { %p352_p2 = pnand %p350_p1, %p347_p0 }
   0x7   :  { %355 = shalt.err (!%p352_p2)
}
   0x8   :  { %s356_s21 = scalar_lea.vmem %s18_s13, 1024  ;;  %p361_p4 = scmp.lt.s32.totalorder %s18_s13, %s18_s13 }
   0x9   :  { %p357_p3 = scmp.ne.s32.totalorder %s18_s13, %s356_s21  ;;  %p362_p5 = scmp.lt.s32.totalorder %s356_s21, %s356_s21 }
   0xb   :  { %p363_p6 = por %p362_p5, %p361_p4 }
   0xd   :  { %p364_p7 = pnand %p363_p6, %p357_p3 }
   0xf   :  { %367 = shalt.err (!%p364_p7)
}
  0x10   :  { %s395_s22 = smov 128   ;;  %s396_s23 = smov 8  }
  0x11   :  { %23 = dma.hbm_to_vmem [thread:$0]  %s479_s1, 1024, %s18_s13, [#allocation3], %s395_s22, %s395_s22, %s396_s23  }
  0x12   :  { %390 = dma.done.wait [#allocation3], 1024  }
  0x13   :  { %391 = vsyncadd [#allocation3], 4294966272  ;;  %vm54_vm0 = vcmask 1043456   ;;  %vm41_vm1 = vcmask 31744   ;;  %v33_v0 = vld [vmem:[#allocation2] sm:$0xff]  ;;  %v30_v2 = vld [vmem:[%s478_s0 + $0x8] sm:$0xff] }
  0x14   :  { %v29_v1 = vld [vmem:[%s478_s0] sm:$0xff]  ;;  %308 = vmatprep.subr.msk.mxu0 %vm54_vm0, %v33_v0  ;;  %v31_v3 = vld [vmem:[%s478_s0 + $0x10] sm:$0xff]  ;;  %v149_v5 = vld [vmem:[#allocation2 + $0x28] sm:$0xff]  ;;  %vm160_vm2 = vcmask 261120   ;;  %s397_s9 = smov [#allocation5]  }
  0x15   :  { %310 = vmatprep.mubr.msk.f32.mxu0 %vm41_vm1, %v29_v1  ;;  %v148_v4 = vld [vmem:[#allocation2 + $0x20] sm:$0xff]  ;;  %309 = vmatpush3.msk.msra.mxu0 %vm54_vm0, %v33_v0  ;;  %v32_v7 = vld [vmem:[%s478_s0 + $0x18] sm:$0xff]  ;;  %v150_v8 = vld [vmem:[#allocation2 + $0x30] sm:$0xff]  ;;  %s271_s10 = sshll.u32 %s397_s9, 4  ;;  %s272_s10 = int_to_ptr.vmem [resolvable:$true] %s271_s10 }
  0x16   :  { %311 = vmatmul.mubr.msk.f32.vlgmr.msra.gmra.mrb[0].mxu0 %vm41_vm1, %v30_v2  ;;  %v330_v6 = vpack.c.bf16 %v149_v5, %v148_v4  ;;  %v151_v9 = vld [vmem:[#allocation2 + $0x38] sm:$0xff]  ;;  %v283_v11 = vld [vmem:[%s480_s2] ss:$0 sm:$0xff]  ;;  %v290_v24 = vld [vmem:[%s480_s2 + $0x1] ss:$0 sm:$0xff]  ;;  %s368_s2 = scalar_lea.vmem %s272_s10, 512  ;;  %p373_p9 = scmp.lt.s32.totalorder %s272_s10, %s272_s10 }
  0x17   :  { %313 = vmatprep.mubr.msk.f32.mxu0 %vm41_vm1, %v31_v3  ;;  %v334_v10 = vpack.c.bf16 %v151_v9, %v150_v8  ;;  %p369_p8 = scmp.ne.s32.totalorder %s272_s10, %s368_s2  ;;  %p374_p10 = scmp.lt.s32.totalorder %s368_s2, %s368_s2 }
  0x18   :  { %331 = vmatprep.subr.bf16.mxu0 %v330_v6  ;;  %338 = vmatprep.subr.bf16.mxu1 %v330_v6 }
  0x19   :  { %333 = vmatpush3.bf16.msra.mxu0 %v330_v6  ;;  %340 = vmatpush3.bf16.msra.mxu1 %v330_v6  ;;  %p375_p11 = por %p374_p10, %p373_p9 }
  0x1a   :  { %314 = vmatmul.mubr.msk.f32.gmra.mrb[2].mxu0 %vm41_vm1, %v32_v7  ;;  %335 = vmatprep.subr.bf16.mxu0 %v334_v10 }
  0x1b   :  { %339 = vmatprep.subr.bf16.mxu1 %v334_v10  ;;  %p376_p12 = pnand %p375_p11, %p369_p8 }
  0x1d   :  { %337 = vmatpush3.bf16.msra.mxu0 %v334_v10  ;;  %341 = vmatpush3.bf16.msra.mxu1 %v334_v10 }
  0xe9   :  { %v312_v12 = vpop.f32.mrb[0].mxu0 }
  0xea   :  { %v130_v13 = vadd.f32 %v312_v12, %v283_v11  ;;  %v124_v14 = vpop.f32.mrb[1].mxu0 }
  0xeb   :  { %v125_v15 = vadd.f32 %v283_v11, %v124_v14 }
  0xec   :  { %v144_v18 = vmax.f32 %v130_v13, 0.0 }
  0xed   :  { %v143_v16 = vmax.f32 %v125_v15, 0.0  ;;  %v315_v17 = vpop.f32.mrb[2].mxu0 }
  0xee   :  { %v140_v19 = vadd.f32 %v315_v17, %v283_v11  ;;  %v134_v20 = vpop.f32.mrb[3].mxu0 }
  0xef   :  { %v135_v21 = vadd.f32 %v283_v11, %v134_v20  ;;  %324 = vmatprep.mubr.msk.f32.mxu0 %vm160_vm2, %v143_v16 }
  0xf0   :  { %325 = vmatmul.mubr.msk.f32.vlgmr.msra.gmra.mrb[4].mxu0 %vm160_vm2, %v144_v18  ;;  %v146_v23 = vmax.f32 %v140_v19, 0.0 }
  0xf1   :  { %v145_v22 = vmax.f32 %v135_v21, 0.0 }
  0xf3   :  { %327 = vmatprep.mubr.msk.f32.mxu1 %vm160_vm2, %v145_v22 }
  0xf4   :  { %328 = vmatmul.mubr.msk.f32.vlgmr.msra.gmra.mrb[0].mxu1 %vm160_vm2, %v146_v23 }
 0x1c3   :  { %v326_v25 = vpop.f32.mrb[4].mxu0 }
 0x1c4   :  { %v245_v26 = vadd.f32 %v326_v25, %v290_v24  ;;  %v239_v27 = vpop.f32.mrb[5].mxu0 }
 0x1c5   :  { %v240_v28 = vadd.f32 %v290_v24, %v239_v27 }
 0x1c6   :  { %v259_v29 = vmax.f32 %v245_v26, 0.0 }
 0x1c7   :  { %v258_v30 = vmax.f32 %v240_v28, 0.0  ;;  %v329_v31 = vpop.f32.mrb[0].mxu1 }
 0x1c8   :  { %263 = vst.msk [vmem:[#allocation5 + $0x8] sm:$0xff] %vm160_vm2, %v259_v29  ;;  %v255_v32 = vadd.f32 %v329_v31, %v290_v24  ;;  %v249_v33 = vpop.f32.mrb[1].mxu1 }
 0x1c9   :  { %262 = vst.msk [vmem:[#allocation5] sm:$0xff] %vm160_vm2, %v258_v30  ;;  %v250_v34 = vadd.f32 %v290_v24, %v249_v33 }
 0x1ca   :  { %v261_v35 = vmax.f32 %v255_v32, 0.0 }
 0x1cb   :  { %v260_v36 = vmax.f32 %v250_v34, 0.0 }
 0x1cc   :  { %265 = vst.msk [vmem:[#allocation5 + $0x18] sm:$0xff] %vm160_vm2, %v261_v35 }
 0x1cd   :  { %264 = vst.msk [vmem:[#allocation5 + $0x10] sm:$0xff] %vm160_vm2, %v260_v36 }
 0x1ce   :  { %379 = shalt.err (!%p376_p12)
}
 0x1cf   :  { %s380_s13 = scalar_lea.hbm %s481_s3, 512 }
 0x1d0   :  { %p381_p13 = scmp.ne.s32.totalorder %s481_s3, %s380_s13  ;;  %p384_p0 = scmp.lt.u32.totalorder %s380_s13, %s481_s3 }
 0x1d2   :  { %p386_p1 = pnand %p384_p0, %p381_p13 }
 0x1d4   :  { %389 = shalt.err (!%p386_p1)
}
 0x1d5   :  { %277 = dma.vmem_to_hbm [thread:$0]  %s272_s10, 512, %s481_s3, [#allocation4], %s395_s22, %s395_s22, %s396_s23  }
 0x1d6   :  { %392 = dma.done.wait [#allocation4], 512  }
 0x1d7   :  { %393 = vsyncadd [#allocation4], 4294966784 }
 0x1d8   :  { %281 = vsyncpa [#allocation3], 1 }
 0x1d9   :  { %282 = vsyncpa [#allocation4], 1 }

</bundles_post_ra>
